<compile_context>
chip_gen: v7x
topology: tpu7x:2x2x1
jax: 0.10.0
libtpu: 0.0.40
codegen_flags: <defaults>
</compile_context>

<pallas_src>
import functools

import jax
import jax.numpy as jnp
import numpy as np
from jax.experimental import pallas as pl
from jax.experimental.pallas import tpu as pltpu


# --------------------------------- PSP module (plain XLA glue) ---------------------------------
def _adaptive_avg_pool_nchw(x, s):
    """Matches torch.nn.AdaptiveAvgPool2d((s, s)); returns (N, C, s*s)."""
    n, c, h, w = x.shape
    rows = []
    for i in range(s):
        h0, h1 = (i * h) // s, -((-(i + 1) * h) // s)
        cols = []
        for j in range(s):
            w0, w1 = (j * w) // s, -((-(j + 1) * w) // s)
            cols.append(jnp.mean(x[:, :, h0:h1, w0:w1], axis=(2, 3)))
        rows.append(jnp.stack(cols, axis=-1))            # (N, C, s)
    return jnp.stack(rows, axis=-2).reshape(n, c, s * s)  # row-major -> (N, C, s*s)


def _maxpool2x2_nchw(x):
    """Matches torch.nn.MaxPool2d(kernel_size=2); returns (N, C, (H//2)*(W//2))."""
    n, c, h, w = x.shape
    h2, w2 = h // 2, w // 2
    xr = x[:, :, : h2 * 2, : w2 * 2].reshape(n, c, h2, 2, w2, 2)
    return jnp.max(xr, axis=(3, 5)).reshape(n, c, h2 * w2)


def psp_module(x, sizes=(1, 2, 3, 6)):
    """PSPModule.forward: concat of adaptive-avg-pool stages + 2x2 max pool -> (N, C, S)."""
    priors = [_adaptive_avg_pool_nchw(x, s) for s in sizes]
    priors.append(_maxpool2x2_nchw(x))
    return jnp.concatenate(priors, axis=-1)


# ----------------------------------- fused PAM attention kernel --------------------------------
def _pam_kernel(x_ref, xpcs_ref, mg_ref, colg_ref, o_ref, *, s_pad):
    f32 = jnp.float32
    x_t = x_ref[0].astype(f32)        # (C, TQ)          pixels on lanes
    xp_cs = xpcs_ref[0].astype(f32)   # (C, S_pad)       value side
    mg = mg_ref[0].astype(f32)        # (S_pad + 8, C)   folded key/query rows + gate row
    colg = colg_ref[0].astype(f32)    # (S_pad + 8, 1)   folded bq term (+ -1e30 pad mask, + bg)

    # One shared contraction over C: energy rows (with mask baked into colg) + the gamma-gate row.
    eg = jnp.dot(mg, x_t, preferred_element_type=f32) + colg    # (S_pad + 8, TQ)
    energy_t = eg[:s_pad]                                       # (S_pad, TQ)
    g = jax.nn.sigmoid(eg[s_pad:s_pad + 1])                     # (1, TQ)   gate row

    # Softmax over the PSP axis (sublanes); normalization deferred into the value matmul.
    e_max = jnp.max(energy_t, axis=0, keepdims=True)            # (1, TQ)
    p = jnp.exp(energy_t - e_max)                               # (S_pad, TQ), pad rows exactly 0
    inv = pl.reciprocal(jnp.sum(p, axis=0, keepdims=True), approx=True)   # (1, TQ)

    # out = proj_value @ attention^T  (attention = p * inv, factored out of the contraction).
    av_t = jnp.dot(xp_cs, p, preferred_element_type=f32) * inv  # (C, TQ)

    # residual blend with the sigmoid gate
    o_ref[0] = ((1.0 - g) * av_t + g * x_t).astype(o_ref.dtype)


def pam_attention(x_flat, xp, wq, bq, wk, bk, wg, bg, *, tq=512):
    """x_flat: (B, C, HW) NCHW-flattened input; xp: (B, C, S) PSP features -> (B, C, HW)."""
    b, c, hw = x_flat.shape
    s = xp.shape[-1]
    hp = jax.lax.Precision.HIGHEST

    # ---- hoisted, pixel-tile-invariant key-side precompute (tiny: O(B*S*(K+C)) values) ----
    # kproj = Wk @ xp + bk;  M = kproj^T @ Wq;  col = kproj^T @ bq
    kproj = jnp.einsum('kc,ncs->nks', wk, xp, precision=hp) + bk[None]      # (B, K, S)
    m = jnp.einsum('nks,kc->nsc', kproj, wq, precision=hp)                  # (B, S, C)
    col = jnp.einsum('nks,ko->nso', kproj, bq, precision=hp)                # (B, S, 1)

    # Pad the PSP axis to 128 (lane/sublane dense, full-width MXU contraction). Padded rows get
    # zero M rows and col = -1e30, so their softmax weight is exactly zero — no in-kernel mask.
    s_pad = ((s + 127) // 128) * 128
    xp_cs = jnp.pad(xp, ((0, 0), (0, 0), (0, s_pad - s)))                   # (B, C, S_pad) value
    m = jnp.pad(m, ((0, 0), (0, s_pad - s), (0, 0)))
    col = jnp.pad(col, ((0, 0), (0, s_pad - s), (0, 0)), constant_values=-1e30)

    # Merge the gamma-gate matmul into the same x_t contraction: 8 extra sublanes, row 0 = Wg/bg.
    g_rows = 8
    wg_block = jnp.zeros((g_rows, c), m.dtype).at[0].set(wg[0].astype(m.dtype))
    bg_block = jnp.zeros((g_rows, 1), col.dtype).at[0, 0].set(bg[0, 0].astype(col.dtype))
    mg = jnp.concatenate([m, jnp.broadcast_to(wg_block[None], (b, g_rows, c))], axis=1)
    colg = jnp.concatenate([col, jnp.broadcast_to(bg_block[None], (b, g_rows, 1))], axis=1)

    # ---- pixel tiling: multiples of 128 lanes (unmasked stores), >= 2 grid steps for v7x ----
    tq_eff = min(tq, hw)
    tq_eff = ((tq_eff + 127) // 128) * 128
    hw_pad = ((hw + tq_eff - 1) // tq_eff) * tq_eff
    n_tiles = hw_pad // tq_eff
    if b * n_tiles < 2 and tq_eff > 128:       # give both v7x TensorCores work
        tq_eff = ((tq_eff // 2 + 127) // 128) * 128
        hw_pad = ((hw + tq_eff - 1) // tq_eff) * tq_eff
        n_tiles = hw_pad // tq_eff
    if hw_pad != hw:                           # zero-pad tail pixels; outputs sliced away below
        x_flat = jnp.pad(x_flat, ((0, 0), (0, 0), (0, hw_pad - hw)))

    kernel = functools.partial(_pam_kernel, s_pad=s_pad)
    out = pl.pallas_call(
        kernel,
        out_shape=jax.ShapeDtypeStruct((b, c, hw_pad), x_flat.dtype),
        grid=(b, n_tiles),
        in_specs=[
            pl.BlockSpec((1, c, tq_eff), lambda bi, qi: (bi, 0, qi)),           # x tile
            pl.BlockSpec((1, c, s_pad), lambda bi, qi: (bi, 0, 0)),             # xp value (C,S)
            pl.BlockSpec((1, s_pad + g_rows, c), lambda bi, qi: (bi, 0, 0)),    # M + gate rows
            pl.BlockSpec((1, s_pad + g_rows, 1), lambda bi, qi: (bi, 0, 0)),    # col + bg
        ],
        out_specs=pl.BlockSpec((1, c, tq_eff), lambda bi, qi: (bi, 0, qi)),
        compiler_params=pltpu.CompilerParams(
            dimension_semantics=("parallel", "parallel"),   # batch x pixel tiles, independent
            vmem_limit_bytes=48 * 1024 * 1024,              # fits v7x's 64 MiB part
        ),
    )(x_flat, xp_cs, mg, colg)

    if hw_pad != hw:
        out = out[:, :, :hw]
    return out


# ------------------------------------------ module wrapper -------------------------------------
def pam_module_forward(x, params, *, psp_size=(1, 2, 3, 6), tq=512):
    """PAM_Module.forward: x (B, C, H, W) -> (B, C, H, W)."""
    n, c, h, w = x.shape
    xp = psp_module(x, psp_size)                 # (B, C, S)
    x_flat = x.reshape(n, c, h * w)              # free reshape (NCHW row-major)
    out = pam_attention(x_flat, xp,
                        params["wq"], params["bq"],
                        params["wk"], params["bk"],
                        params["wg"], params["bg"], tq=tq)
    return out.reshape(n, c, h, w)


# --------------------------------------- pure-JAX reference ------------------------------------
def pam_reference(x, params, psp_size=(1, 2, 3, 6)):
    n, c, h, w = x.shape
    hp = jax.lax.Precision.HIGHEST
    xp = psp_module(x, psp_size)                                                 # (n, C, S)
    xf = x.reshape(n, c, h * w)
    q = jnp.einsum('kc,ncp->nkp', params["wq"], xf, precision=hp) + params["bq"][None]
    kproj = jnp.einsum('kc,ncs->nks', params["wk"], xp, precision=hp) + params["bk"][None]
    energy = jnp.einsum('nkp,nks->nps', q, kproj, precision=hp)                  # (n, HW, S)
    energy = energy - jnp.max(energy, axis=-1, keepdims=True)
    attn = jnp.exp(energy)
    attn = attn / jnp.sum(attn, axis=-1, keepdims=True)
    out = jnp.einsum('ncs,nps->ncp', xp, attn, precision=hp).reshape(n, c, h, w)
    g = jax.nn.sigmoid(jnp.einsum('oc,ncp->nop', params["wg"], xf, precision=hp)
                       + params["bg"][None]).reshape(n, 1, h, w)
    return (1.0 - g) * out + g * x


if __name__ == "__main__":
    key = jax.random.PRNGKey(0)
    N, C, K, H, W = 2, 32, 16, 16, 16          # in_dim=32, key_dim=16
    ks = jax.random.split(key, 7)

    x = jax.random.normal(ks[0], (N, C, H, W), jnp.float32)

    # query_conv: Conv2d(C, K, 1, bias=True); key_conv: Conv1d(C, K, 1, bias=True)
    wq = 0.1 * jax.random.normal(ks[1], (K, C), jnp.float32)
    bq = 0.1 * jax.random.normal(ks[2], (K, 1), jnp.float32)
    wk = 0.1 * jax.random.normal(ks[3], (K, C), jnp.float32)
    bk = 0.1 * jax.random.normal(ks[4], (K, 1), jnp.float32)
    # gamma: Conv2d(C, 1, 1, bias=True) + Sigmoid
    wg = 0.1 * jax.random.normal(ks[5], (1, C), jnp.float32)
    bg = 0.1 * jax.random.normal(ks[6], (1, 1), jnp.float32)

    params = {"wq": wq, "bq": bq, "wk": wk, "bk": bk, "wg": wg, "bg": bg}

    out = jax.jit(pam_module_forward)(x, params)
    jax.block_until_ready(out)
    assert out.shape == (N, C, H, W) and out.dtype == jnp.float32

    ref = pam_reference(x, params)
    np.testing.assert_allclose(np.asarray(out), np.asarray(ref), rtol=2e-2, atol=2e-2)
    print("KERNEL_OK")
</pallas_src>

<mosaic_0001>
module attributes {stable_mosaic.version = 11 : i64} {
  func.func @_pam_kernel(%arg0: i32, %arg1: i32, %arg2: memref<1x32x256xf32, #tpu.memory_space<vmem>>, %arg3: memref<1x32x128xf32, #tpu.memory_space<vmem>>, %arg4: memref<1x136x32xf32, #tpu.memory_space<vmem>>, %arg5: memref<1x136x1xf32, #tpu.memory_space<vmem>>, %arg6: memref<1x32x256xf32, #tpu.memory_space<vmem>>) attributes {dimension_semantics = [#tpu.dimension_semantics<parallel>, #tpu.dimension_semantics<parallel>], iteration_bounds = array<i64: 2, 1>, scalar_prefetch = 0 : i64, scratch_operands = 0 : i64, tpu.core_type = #tpu.core_type<tc>, window_params = [{transform_indices = @transform_0, window_bounds = array<i64: 1, 32, 256>}, {transform_indices = @transform_1, window_bounds = array<i64: 1, 32, 128>}, {transform_indices = @transform_2, window_bounds = array<i64: 1, 136, 32>}, {transform_indices = @transform_3, window_bounds = array<i64: 1, 136, 1>}, {transform_indices = @transform_4, window_bounds = array<i64: 1, 32, 256>}]} {
    %c0 = arith.constant 0 : index
    %c0_0 = arith.constant 0 : index
    %c0_1 = arith.constant 0 : index
    %0 = vector.load %arg2[%c0, %c0_0, %c0_1] : memref<1x32x256xf32, #tpu.memory_space<vmem>>, vector<1x32x256xf32>
    %1 = vector.shape_cast %0 : vector<1x32x256xf32> to vector<32x256xf32>
    %c0_2 = arith.constant 0 : index
    %c0_3 = arith.constant 0 : index
    %c0_4 = arith.constant 0 : index
    %2 = vector.load %arg3[%c0_2, %c0_3, %c0_4] : memref<1x32x128xf32, #tpu.memory_space<vmem>>, vector<1x32x128xf32>
    %3 = vector.shape_cast %2 : vector<1x32x128xf32> to vector<32x128xf32>
    %c0_5 = arith.constant 0 : index
    %c0_6 = arith.constant 0 : index
    %c0_7 = arith.constant 0 : index
    %4 = vector.load %arg4[%c0_5, %c0_6, %c0_7] : memref<1x136x32xf32, #tpu.memory_space<vmem>>, vector<1x136x32xf32>
    %5 = vector.shape_cast %4 : vector<1x136x32xf32> to vector<136x32xf32>
    %c0_8 = arith.constant 0 : index
    %c0_9 = arith.constant 0 : index
    %c0_10 = arith.constant 0 : index
    %6 = vector.load %arg5[%c0_8, %c0_9, %c0_10] : memref<1x136x1xf32, #tpu.memory_space<vmem>>, vector<1x136x1xf32>
    %7 = vector.shape_cast %6 : vector<1x136x1xf32> to vector<136x1xf32>
    %cst = arith.constant dense<0.000000e+00> : vector<136x256xf32>
    %8 = tpu.matmul %5, %1, %cst {dimension_numbers = #tpu.dot_dimension_numbers<[1], [0], [0], [1], [0, 0, 1, 1], [], []>} : vector<136x32xf32>, vector<32x256xf32>, vector<136x256xf32> -> vector<136x256xf32>
    %9 = vector.broadcast %7 : vector<136x1xf32> to vector<136x256xf32>
    %10 = arith.addf %8, %9 : vector<136x256xf32>
    %11 = vector.extract_strided_slice %10 {offsets = [0, 0], sizes = [128, 256], strides = [1, 1]} : vector<136x256xf32> to vector<128x256xf32>
    %12 = vector.extract_strided_slice %10 {offsets = [128, 0], sizes = [1, 256], strides = [1, 1]} : vector<136x256xf32> to vector<1x256xf32>
    %13 = arith.negf %12 : vector<1x256xf32>
    %14 = math.exp %13 : vector<1x256xf32>
    %cst_11 = arith.constant 1.000000e+00 : f32
    %15 = vector.broadcast %cst_11 : f32 to vector<1x256xf32>
    %16 = arith.addf %15, %14 : vector<1x256xf32>
    %17 = arith.divf %15, %16 : vector<1x256xf32>
    %cst_12 = arith.constant dense<0xFF800000> : vector<256xf32>
    %18 = vector.multi_reduction <maximumf>, %11, %cst_12 [0] : vector<128x256xf32> to vector<256xf32>
    %19 = vector.shape_cast %18 : vector<256xf32> to vector<1x256xf32>
    %20 = vector.broadcast %19 : vector<1x256xf32> to vector<128x256xf32>
    %21 = arith.subf %11, %20 : vector<128x256xf32>
    %22 = math.exp %21 : vector<128x256xf32>
    %cst_13 = arith.constant dense<0.000000e+00> : vector<256xf32>
    %23 = vector.multi_reduction <add>, %22, %cst_13 [0] : vector<128x256xf32> to vector<256xf32>
    %24 = vector.shape_cast %23 : vector<256xf32> to vector<1x256xf32>
    %25 = tpu.reciprocal %24 {approx = true} : vector<1x256xf32> -> vector<1x256xf32>
    %cst_14 = arith.constant dense<0.000000e+00> : vector<32x256xf32>
    %26 = tpu.matmul %3, %22, %cst_14 {dimension_numbers = #tpu.dot_dimension_numbers<[1], [0], [0], [1], [0, 0, 1, 1], [], []>} : vector<32x128xf32>, vector<128x256xf32>, vector<32x256xf32> -> vector<32x256xf32>
    %27 = vector.broadcast %25 : vector<1x256xf32> to vector<32x256xf32>
    %28 = arith.mulf %26, %27 : vector<32x256xf32>
    %cst_15 = arith.constant 1.000000e+00 : f32
    %29 = vector.broadcast %cst_15 : f32 to vector<1x256xf32>
    %30 = arith.subf %29, %17 : vector<1x256xf32>
    %31 = vector.broadcast %30 : vector<1x256xf32> to vector<32x256xf32>
    %32 = arith.mulf %31, %28 : vector<32x256xf32>
    %33 = vector.broadcast %17 : vector<1x256xf32> to vector<32x256xf32>
    %34 = arith.mulf %33, %1 : vector<32x256xf32>
    %35 = arith.addf %32, %34 : vector<32x256xf32>
    %c0_16 = arith.constant 0 : index
    %c0_17 = arith.constant 0 : index
    %c0_18 = arith.constant 0 : index
    %36 = vector.load %arg6[%c0_16, %c0_17, %c0_18] : memref<1x32x256xf32, #tpu.memory_space<vmem>>, vector<1x32x256xf32>
    %37 = vector.shape_cast %36 : vector<1x32x256xf32> to vector<32x256xf32>
    %38 = vector.shape_cast %35 : vector<32x256xf32> to vector<1x32x256xf32>
    tpu.vector_store %arg6[%c0_16, %c0_17, %c0_18], %38 {strides = array<i32>} : memref<1x32x256xf32, #tpu.memory_space<vmem>>, vector<1x32x256xf32>,
    return
  }
  func.func @transform_0(%arg0: i32, %arg1: i32) -> (i32, i32, i32) {
    %c0_i32 = arith.constant 0 : i32
    %c0_i32_0 = arith.constant 0 : i32
    return %arg0, %c0_i32, %arg1 : i32, i32, i32
  }
  func.func @transform_1(%arg0: i32, %arg1: i32) -> (i32, i32, i32) {
    %c0_i32 = arith.constant 0 : i32
    %c0_i32_0 = arith.constant 0 : i32
    %c0_i32_1 = arith.constant 0 : i32
    return %arg0, %c0_i32, %c0_i32_0 : i32, i32, i32
  }
  func.func @transform_2(%arg0: i32, %arg1: i32) -> (i32, i32, i32) {
    %c0_i32 = arith.constant 0 : i32
    %c0_i32_0 = arith.constant 0 : i32
    %c0_i32_1 = arith.constant 0 : i32
    return %arg0, %c0_i32, %c0_i32_0 : i32, i32, i32
  }
  func.func @transform_3(%arg0: i32, %arg1: i32) -> (i32, i32, i32) {
    %c0_i32 = arith.constant 0 : i32
    %c0_i32_0 = arith.constant 0 : i32
    %c0_i32_1 = arith.constant 0 : i32
    return %arg0, %c0_i32, %c0_i32_0 : i32, i32, i32
  }
  func.func @transform_4(%arg0: i32, %arg1: i32) -> (i32, i32, i32) {
    %c0_i32 = arith.constant 0 : i32
    %c0_i32_0 = arith.constant 0 : i32
    return %arg0, %c0_i32, %arg1 : i32, i32, i32
  }
}

</mosaic_0001>

<bundles_post_ra>
// kernel: pam_module_forward.1
= control target key start
LH: loop header
LB: loop body
LE: loop exit
PB: predicated region body
PF: predicated region fallthrough
CT: control target
= control target key end

     0   :  { %s1344_s15 = smov 0   ;;  %s1346_s16 = smov 0   ;;  %s1768_s0 = inlined_call_operand.vmem [shape: f32[2,32,256], index: 0, kind: input, shape index: {}]   ;;  %s1769_s1 = inlined_call_operand.vmem [shape: f32[2,32,128], index: 1, kind: input, shape index: {}]   ;;  %s1770_s2 = inlined_call_operand.vmem [shape: f32[2,136,32], index: 2, kind: input, shape index: {}]   ;;  %s1771_s3 = inlined_call_operand.vmem [shape: f32[2,136,1], index: 3, kind: input, shape index: {}]   ;;  %s1772_s4 = inlined_call_operand.vmem [shape: f32[2,32,256], index: 4, kind: output, shape index: {}]  }
   0x1   :  { %s1348_s17 = smov 0  }
   0x2 LB: > { %s26_s18 = sadd.s32 1, %s1311_s16  ;;  %p1115_p0 = scmp.ge.s32.totalorder %s1315_s17, 1  ;;  %s1315_s17 = sphi %s1348_s17, %s14_s17   ;;  %s1311_s16 = sphi %s1346_s16, %s1774_s16   ;;  %s1307_s15 = sphi %s1344_s15, %s1773_s15  }
   0x3   : > { %p28_p1 = scmp.ge.s32.totalorder %s26_s18, 2  ;;  %p213_p2 = scmp.lt.s32.totalorder %s1315_s17, 3 }
   0x5   : > { %s1776_s18 = smov (%p28_p1, %s26_s18), 0  ;;  %p214_p3 = pnand %p1115_p0, %p213_p2 }
   0x6   : > { %p263_p4 = scmp.lt.s32.totalorder (!%p214_p3), %s1307_s15, 1  ;;  %v1317_v0 = vmov (!%p214_p3), 0.0   ;;  %v1318_v1 = vmov (!%p214_p3), 0   ;;  %vm428_vm0 = vcmask (!%p214_p3), 261120  }
   0x7   : > { %217 = sbr.rel (%p214_p3) target bundleno = 617 (0x269), region = 36  ;;  %544 = vmatprep.mubr.f32.mxu0 (!%p214_p3), %v1317_v0  ;;  %1215 = vset.pattern.permute.xlu0 (!%p214_p3), %v1318_v1 }
   0x8   : > { %1216 = vset.pattern.permute.xlu1 (!%p214_p3), %v1318_v1  ;;  %905 = vmatprep.mubr.f32.mxu1 (!%p214_p3), %v1317_v0 }
   0xe   : > { %s1778_s15 = smov (!%p263_p4, %s1307_s15), 1 }
   0xf   : > { %s1145_s19 = sshll.u32 %s1778_s15, 6  ;;  %s1188_s23 = smul.u32 136, %s1778_s15 }
  0x10   : > { %s270_s22 = scalar_lea.vmem %s1768_s0, %s1145_s19  ;;  %s1146_s30 = sshll.u32 %s1778_s15, 5 }
  0x11   : > { %v1372_v2 = vld [vmem:[%s270_s22 + $0x8] sm:$0xff]  ;;  %v1374_v3 = vld [vmem:[%s270_s22 + $0x18] sm:$0xff]  ;;  %v1376_v4 = vld [vmem:[%s270_s22] sm:$0xff]  ;;  %s1400_s26 = scalar_lea.vmem %s1770_s2, %s1188_s23  ;;  %s1405_s29 = scalar_lea.vmem %s1771_s3, %s1188_s23 }
  0x12   : > { %v1148_v5 = vpack.c.bf16 %v1374_v3, %v1372_v2  ;;  %v1381_v6 = vld [vmem:[%s270_s22 + $0x10] sm:$0xff]  ;;  %v1383_v7 = vld [vmem:[%s270_s22 + $0x28] sm:$0xff]  ;;  %v1385_v8 = vld [vmem:[%s270_s22 + $0x38] sm:$0xff]  ;;  %s276_s7 = scalar_lea.vmem %s1769_s1, %s1146_s30  ;;  %s1742_s10 = scalar_lea.vmem %s1772_s4, %s1145_s19 }
  0x13   : > { %v1150_v9 = vpack.c.bf16 %v1381_v6, %v1376_v4  ;;  %v1152_v10 = vpack.c.bf16 %v1385_v8, %v1383_v7  ;;  %v1391_v11 = vld [vmem:[%s270_s22 + $0x20] sm:$0xff]  ;;  %v1393_v12 = vld [vmem:[%s270_s22 + $0x30] sm:$0xff]  ;;  %v327_v17 = vld [vmem:[%s1405_s29 + $0x8] sm:$0xff] }
  0x14   : > { %1149 = vmatprep.subr.bf16.mxu0 %v1148_v5  ;;  %v1154_v13 = vpack.c.bf16 %v1393_v12, %v1391_v11  ;;  %v309_v14 = vld [vmem:[%s1400_s26] sm:$0xff]  ;;  %v328_v16 = vld [vmem:[%s1405_s29 + $0x10] sm:$0xff]  ;;  %v329_v18 = vld [vmem:[%s1405_s29 + $0x18] sm:$0xff] }
  0x15   : > { %1151 = vmatpush1.bf16.msra.mxu0 %v1150_v9  ;;  %v326_v15 = vld [vmem:[%s1405_s29] sm:$0xff]  ;;  %355 = vperm.xlu1 %1216, %v328_v16   ;;  %v310_v19 = vld [vmem:[%s1400_s26 + $0x8] sm:$0xff]  ;;  %v311_v22 = vld [vmem:[%s1400_s26 + $0x10] sm:$0xff] }
  0x16   : > { %1153 = vmatprep.subr.bf16.mxu0 %v1152_v10  ;;  %345 = vperm.xlu0 %1215, %v326_v15   ;;  %v330_v20 = vld [vmem:[%s1405_s29 + $0x20] sm:$0xff]  ;;  %v331_v21 = vld [vmem:[%s1405_s29 + $0x28] sm:$0xff]  ;;  %v332_v23 = vld [vmem:[%s1405_s29 + $0x30] sm:$0xff] }
  0x17   : > { %v333_v24 = vld [vmem:[%s1405_s29 + $0x38] sm:$0xff]  ;;  %v334_v26 = vld [vmem:[%s1405_s29 + $0x40] sm:$0xff]  ;;  %v335_v27 = vld [vmem:[%s1405_s29 + $0x48] sm:$0xff] }
  0x18   : > { %v312_v25 = vld [vmem:[%s1400_s26 + $0x18] sm:$0xff]  ;;  %v313_v28 = vld [vmem:[%s1400_s26 + $0x20] sm:$0xff]  ;;  %v336_v29 = vld [vmem:[%s1405_s29 + $0x50] sm:$0xff] }
  0x19   : > { %1155 = vmatpush1.bf16.msra.mxu0 %v1154_v13  ;;  %360 = vperm.xlu1 %1216, %v329_v18   ;;  %v337_v30 = vld [vmem:[%s1405_s29 + $0x58] sm:$0xff]  ;;  %v314_v31 = vld [vmem:[%s1400_s26 + $0x28] sm:$0xff]  ;;  %v338_v32 = vld [vmem:[%s1405_s29 + $0x60] sm:$0xff] }
  0x1a   : > { %350 = vperm.xlu0 %1215, %v327_v17   ;;  %v339_v33 = vld [vmem:[%s1405_s29 + $0x68] sm:$0xff]  ;;  %v315_v34 = vld [vmem:[%s1400_s26 + $0x30] sm:$0xff]  ;;  %v341_v36 = vld [vmem:[%s1405_s29 + $0x78] sm:$0xff] }
  0x1b   : > { %v340_v35 = vld [vmem:[%s1405_s29 + $0x70] sm:$0xff]  ;;  %v316_v37 = vld [vmem:[%s1400_s26 + $0x38] sm:$0xff]  ;;  %v342_v38 = vld [vmem:[%s1405_s29 + $0x80] sm:$0xff] }
  0x1c   : > { %1124 = vmatmul.mubr.msk.f32.vlgmr.msra.gmra.mrb[0].mxu0 %vm428_vm0, %v309_v14  ;;  %v317_v39 = vld [vmem:[%s1400_s26 + $0x40] sm:$0xff]  ;;  %v318_v40 = vld [vmem:[%s1400_s26 + $0x48] sm:$0xff]  ;;  %v319_v41 = vld [vmem:[%s1400_s26 + $0x50] sm:$0xff] }
  0x1d   : > { %550 = vmatprep.mubr.f32.mxu0 %v1317_v0  ;;  %370 = vperm.xlu1 %1216, %v331_v21   ;;  %v320_v42 = vld [vmem:[%s1400_s26 + $0x58] sm:$0xff]  ;;  %v321_v43 = vld [vmem:[%s1400_s26 + $0x60] sm:$0xff]  ;;  %v322_v44 = vld [vmem:[%s1400_s26 + $0x68] sm:$0xff] }
  0x1e   : > { %365 = vperm.xlu0 %1215, %v330_v20   ;;  %v323_v45 = vld [vmem:[%s1400_s26 + $0x70] sm:$0xff]  ;;  %v324_v46 = vld [vmem:[%s1400_s26 + $0x78] sm:$0xff]  ;;  %v325_v47 = vld [vmem:[%s1400_s26 + $0x80] sm:$0xff] }
  0x20   : > { %1125 = vmatmul.mubr.msk.f32.gmra.mrb[2].mxu0 %vm428_vm0, %v310_v19 }
  0x21   : > { %556 = vmatprep.mubr.f32.mxu0 %v1317_v0  ;;  %380 = vperm.xlu1 %1216, %v333_v24  }
  0x22   : > { %375 = vperm.xlu0 %1215, %v332_v23  }
  0x24   : > { %1126 = vmatmul.mubr.msk.f32.gmra.mrb[4].mxu0 %vm428_vm0, %v311_v22 }
  0x25   : > { %562 = vmatprep.mubr.f32.mxu0 %v1317_v0  ;;  %390 = vperm.xlu1 %1216, %v335_v27  }
  0x26   : > { %385 = vperm.xlu0 %1215, %v334_v26  }
  0x28   : > { %1127 = vmatmul.mubr.msk.f32.gmra.mrb[6].mxu0 %vm428_vm0, %v312_v25 }
  0x29   : > { %568 = vmatprep.mubr.f32.mxu0 %v1317_v0  ;;  %400 = vperm.xlu1 %1216, %v337_v30  }
  0x2a   : > { %395 = vperm.xlu0 %1215, %v336_v29  }
  0x2c   : > { %1128 = vmatmul.mubr.msk.f32.gmra.mrb[8].mxu0 %vm428_vm0, %v313_v28 }
  0x2d   : > { %574 = vmatprep.mubr.f32.mxu0 %v1317_v0  ;;  %410 = vperm.xlu1 %1216, %v339_v33  }
  0x2e   : > { %405 = vperm.xlu0 %1215, %v338_v32  }
  0x30   : > { %1129 = vmatmul.mubr.msk.f32.gmra.mrb[10].mxu0 %vm428_vm0, %v314_v31 }
  0x31   : > { %580 = vmatprep.mubr.f32.mxu0 %v1317_v0  ;;  %420 = vperm.xlu1 %1216, %v341_v36  }
  0x32   : > { %415 = vperm.xlu0 %1215, %v340_v35  }
  0x34   : > { %1130 = vmatmul.mubr.msk.f32.gmra.mrb[12].mxu0 %vm428_vm0, %v315_v34 }
  0x35   : > { %586 = vmatprep.mubr.f32.mxu0 %v1317_v0 }
  0x36   : > { %425 = vperm.xlu0 %1215, %v342_v38  }
  0x38   : > { %1131 = vmatmul.mubr.msk.f32.gmra.mrb[14].mxu0 %vm428_vm0, %v316_v37 }
  0x39   : > { %592 = vmatprep.mubr.f32.mxu0 %v1317_v0 }
  0x3c   : > { %1132 = vmatmul.mubr.msk.f32.gmra.mrb[16].mxu0 %vm428_vm0, %v317_v39 }
  0x3d   : > { %598 = vmatprep.mubr.f32.mxu0 %v1317_v0 }
  0x40   : > { %1133 = vmatmul.mubr.msk.f32.gmra.mrb[18].mxu0 %vm428_vm0, %v318_v40 }
  0x41   : > { %604 = vmatprep.mubr.f32.mxu0 %v1317_v0 }
  0x44   : > { %1134 = vmatmul.mubr.msk.f32.gmra.mrb[20].mxu0 %vm428_vm0, %v319_v41 }
  0x45   : > { %610 = vmatprep.mubr.f32.mxu0 %v1317_v0 }
  0x48   : > { %1135 = vmatmul.mubr.msk.f32.gmra.mrb[22].mxu0 %vm428_vm0, %v320_v42 }
  0x49   : > { %616 = vmatprep.mubr.f32.mxu0 %v1317_v0 }
  0x4c   : > { %1136 = vmatmul.mubr.msk.f32.gmra.mrb[24].mxu0 %vm428_vm0, %v321_v43 }
  0x4d   : > { %622 = vmatprep.mubr.f32.mxu0 %v1317_v0 }
  0x50   : > { %1137 = vmatmul.mubr.msk.f32.gmra.mrb[26].mxu0 %vm428_vm0, %v322_v44 }
  0x51   : > { %628 = vmatprep.mubr.f32.mxu0 %v1317_v0 }
  0x54   : > { %1138 = vmatmul.mubr.msk.f32.gmra.mrb[28].mxu0 %vm428_vm0, %v323_v45 }
  0x55   : > { %634 = vmatprep.mubr.f32.mxu0 %v1317_v0 }
  0x58   : > { %1139 = vmatmul.mubr.msk.f32.gmra.mrb[30].mxu0 %vm428_vm0, %v324_v46 }
  0x59   : > { %640 = vmatprep.mubr.f32.mxu0 %v1317_v0 }
  0x5c   : > { %1140 = vmatmul.mubr.msk.f32.gmra.mrb[32].mxu0 %vm428_vm0, %v325_v47 }
  0x94   : > { %v356_v53 = vpop.permute.xlu1 %355 }
  0x95   : > { %v346_v50 = vpop.permute.xlu0 %345 }
  0x98   : > { %v361_v62 = vpop.permute.xlu1 %360 }
  0x99   : > { %v351_v59 = vpop.permute.xlu0 %350 }
  0x9c   : > { %v371_v23 = vpop.permute.xlu1 %370 }
  0x9d   : > { %v366_v16 = vpop.permute.xlu0 %365 }
  0xa0   : > { %v381_v37 = vpop.permute.xlu1 %380 }
  0xa1   : > { %v376_v30 = vpop.permute.xlu0 %375 }
  0xa5   : > { %v386_v44 = vpop.permute.xlu0 %385 }
  0xef   : > { %v546_v48 = vpop.f32.mrb[0].mxu0 }
  0xf0   : > { %v548_v49 = vpop.f32.mrb[1].mxu0  ;;  %v1474_v55 = vadd.f32 %v546_v48, %v346_v50 }
  0xf1   : > { %v1478_v58 = vadd.f32 %v548_v49, %v346_v50 }
  0xf3   : > { %v552_v51 = vpop.f32.mrb[2].mxu0 }
  0xf4   : > { %v554_v52 = vpop.f32.mrb[3].mxu0  ;;  %v1486_v5 = vadd.f32 %v552_v51, %v351_v59  ;;  %v391_v51 = vpop.permute.xlu1 %390 }
  0xf5   : > { %v1490_v13 = vadd.f32 %v554_v52, %v351_v59 }
  0xf7   : > { %v558_v54 = vpop.f32.mrb[4].mxu0 }
  0xf8   : > { %v1476_v56 = vadd.f32 %v558_v54, %v356_v53  ;;  %v560_v57 = vpop.f32.mrb[5].mxu0 }
  0xf9   : > { %v1480_v60 = vadd.f32 %v560_v57, %v356_v53 }
  0xfa   : > { %v659_v61 = vmax.f32 %v1474_v55, %v1476_v56 }
  0xfb   : > { %v680_v63 = vmax.f32 %v1478_v58, %v1480_v60  ;;  %v564_v1 = vpop.f32.mrb[6].mxu0 }
  0xfc   : > { %v1488_v9 = vadd.f32 %v564_v1, %v361_v62  ;;  %v566_v10 = vpop.f32.mrb[7].mxu0 }
  0xfd   : > { %v1492_v14 = vadd.f32 %v566_v10, %v361_v62  ;;  %v396_v62 = vpop.permute.xlu0 %395 }
  0xfe   : > { %v660_v15 = vmax.f32 %v1486_v5, %v1488_v9 }
  0xff   : > { %v681_v17 = vmax.f32 %v1490_v13, %v1492_v14  ;;  %v570_v18 = vpop.f32.mrb[8].mxu0 }
 0x100   : > { %v1498_v19 = vadd.f32 %v570_v18, %v366_v16  ;;  %v572_v20 = vpop.f32.mrb[9].mxu0  ;;  %v401_v18 = vpop.permute.xlu1 %400 }
 0x101   : > { %v1500_v21 = vadd.f32 %v572_v20, %v366_v16 }
 0x102   : > { %v661_v22 = vmax.f32 %v659_v61, %v1498_v19 }
 0x103   : > { %v682_v24 = vmax.f32 %v680_v63, %v1500_v21  ;;  %v576_v25 = vpop.f32.mrb[10].mxu0 }
 0x104   : > { %v1504_v26 = vadd.f32 %v576_v25, %v371_v23  ;;  %v578_v27 = vpop.f32.mrb[11].mxu0 }
 0x105   : > { %v1506_v28 = vadd.f32 %v578_v27, %v371_v23 }
 0x106   : > { %v662_v29 = vmax.f32 %v660_v15, %v1504_v26 }
 0x107   : > { %v683_v31 = vmax.f32 %v681_v17, %v1506_v28  ;;  %v582_v32 = vpop.f32.mrb[12].mxu0 }
 0x108   : > { %v1510_v33 = vadd.f32 %v582_v32, %v376_v30  ;;  %v584_v34 = vpop.f32.mrb[13].mxu0 }
 0x109   : > { %v1512_v35 = vadd.f32 %v584_v34, %v376_v30 }
 0x10a   : > { %v663_v36 = vmax.f32 %v661_v22, %v1510_v33 }
 0x10b   : > { %v684_v38 = vmax.f32 %v682_v24, %v1512_v35  ;;  %v588_v39 = vpop.f32.mrb[14].mxu0 }
 0x10c   : > { %v1516_v40 = vadd.f32 %v588_v39, %v381_v37  ;;  %v590_v41 = vpop.f32.mrb[15].mxu0 }
 0x10d   : > { %v1518_v42 = vadd.f32 %v590_v41, %v381_v37 }
 0x10e   : > { %v664_v43 = vmax.f32 %v662_v29, %v1516_v40  ;;  %v406_v29 = vpop.permute.xlu0 %405 }
 0x10f   : > { %v685_v45 = vmax.f32 %v683_v31, %v1518_v42  ;;  %v594_v46 = vpop.f32.mrb[16].mxu0 }
 0x110   : > { %v1522_v47 = vadd.f32 %v594_v46, %v386_v44  ;;  %v596_v48 = vpop.f32.mrb[17].mxu0 }
 0x111   : > { %v1524_v49 = vadd.f32 %v596_v48, %v386_v44 }
 0x112   : > { %v665_v50 = vmax.f32 %v663_v36, %v1522_v47  ;;  %v416_v48 = vpop.permute.xlu0 %415 }
 0x113   : > { %v686_v52 = vmax.f32 %v684_v38, %v1524_v49  ;;  %v600_v53 = vpop.f32.mrb[18].mxu0  ;;  %v411_v38 = vpop.permute.xlu1 %410 }
 0x114   : > { %v1528_v54 = vadd.f32 %v600_v53, %v391_v51  ;;  %v602_v57 = vpop.f32.mrb[19].mxu0 }
 0x115   : > { %v1530_v59 = vadd.f32 %v602_v57, %v391_v51 }
 0x116   : > { %v666_v61 = vmax.f32 %v664_v43, %v1528_v54 }
 0x117   : > { %v687_v63 = vmax.f32 %v685_v45, %v1530_v59  ;;  %v606_v1 = vpop.f32.mrb[20].mxu0 }
 0x118   : > { %v1534_v10 = vadd.f32 %v606_v1, %v396_v62  ;;  %v608_v15 = vpop.f32.mrb[21].mxu0 }
 0x119   : > { %v1536_v16 = vadd.f32 %v608_v15, %v396_v62  ;;  %v421_v62 = vpop.permute.xlu1 %420 }
 0x11a   : > { %v667_v17 = vmax.f32 %v665_v50, %v1534_v10 }
 0x11b   : > { %v688_v20 = vmax.f32 %v686_v52, %v1536_v16  ;;  %v612_v22 = vpop.f32.mrb[22].mxu0 }
 0x11c   : > { %v1540_v23 = vadd.f32 %v612_v22, %v401_v18  ;;  %v614_v24 = vpop.f32.mrb[23].mxu0 }
 0x11d   : > { %v1542_v25 = vadd.f32 %v614_v24, %v401_v18 }
 0x11e   : > { %v668_v27 = vmax.f32 %v666_v61, %v1540_v23 }
 0x11f   : > { %v689_v30 = vmax.f32 %v687_v63, %v1542_v25  ;;  %v618_v31 = vpop.f32.mrb[24].mxu0 }
 0x120   : > { %v1546_v32 = vadd.f32 %v618_v31, %v406_v29  ;;  %v620_v34 = vpop.f32.mrb[25].mxu0 }
 0x121   : > { %v1548_v36 = vadd.f32 %v620_v34, %v406_v29 }
 0x122   : > { %v669_v37 = vmax.f32 %v667_v17, %v1546_v32 }
 0x123   : > { %v690_v39 = vmax.f32 %v688_v20, %v1548_v36  ;;  %v624_v41 = vpop.f32.mrb[26].mxu0 }
 0x124   : > { %v1552_v43 = vadd.f32 %v624_v41, %v411_v38  ;;  %v626_v44 = vpop.f32.mrb[27].mxu0 }
 0x125   : > { %v1554_v45 = vadd.f32 %v626_v44, %v411_v38 }
 0x126   : > { %v670_v46 = vmax.f32 %v668_v27, %v1552_v43 }
 0x127   : > { %v691_v50 = vmax.f32 %v689_v30, %v1554_v45  ;;  %v630_v51 = vpop.f32.mrb[28].mxu0 }
 0x128   : > { %v1558_v52 = vadd.f32 %v630_v51, %v416_v48  ;;  %v632_v53 = vpop.f32.mrb[29].mxu0 }
 0x129   : > { %v1560_v57 = vadd.f32 %v632_v53, %v416_v48 }
 0x12a   : > { %v671_v61 = vmax.f32 %v669_v37, %v1558_v52 }
 0x12b   : > { %v692_v63 = vmax.f32 %v690_v39, %v1560_v57  ;;  %v636_v1 = vpop.f32.mrb[30].mxu0 }
 0x12c   : > { %v637_v15 = vadd.f32 %v636_v1, %v421_v62  ;;  %v638_v17 = vpop.f32.mrb[31].mxu0 }
 0x12d   : > { %v639_v18 = vadd.f32 %v638_v17, %v421_v62 }
 0x12e   : > { %v672_v20 = vmax.f32 %v670_v46, %v637_v15 }
 0x12f   : > { %v693_v22 = vmax.f32 %v691_v50, %v639_v18  ;;  %v1564_v24 = vpop.f32.mrb[32].mxu0 }
 0x130   : > { %v673_v27 = vmax.f32 %v671_v61, %v672_v20  ;;  %v1566_v29 = vpop.f32.mrb[33].mxu0 }
 0x131   : > { %v694_v30 = vmax.f32 %v692_v63, %v693_v22 }
 0x132   : > { %v674_v31 = vrot.slane %v673_v27, 4 }
 0x133   : > { %v695_v34 = vrot.slane %v694_v30, 4 }
 0x134   : > { %v675_v38 = vmax.f32 %v673_v27, %v674_v31 }
 0x135   : > { %v696_v41 = vmax.f32 %v694_v30, %v695_v34 }
 0x136   : > { %v676_v37 = vrot.slane %v675_v38, 2 }
 0x137   : > { %v697_v44 = vrot.slane %v696_v41, 2 }
 0x138   : > { %v677_v48 = vmax.f32 %v675_v38, %v676_v37 }
 0x139   : > { %v698_v39 = vmax.f32 %v696_v41, %v697_v44 }
 0x13a   : > { %v678_v51 = vrot.slane %v677_v48, 1 }
 0x13b   : > { %v699_v53 = vrot.slane %v698_v39, 1 }
 0x13c   : > { %v1568_v1 = vmax.f32 %v677_v48, %v678_v51 }
 0x13d   : > { %v1570_v46 = vmax.f32 %v698_v39, %v699_v53 }
 0x13e   : > { %v731_v50 = vsub.f32 %v637_v15, %v1568_v1  ;;  %v701_v61 = vsub.f32 %v1474_v55, %v1568_v1  ;;  %v703_v62 = vsub.f32 %v1486_v5, %v1568_v1  ;;  %v705_v63 = vsub.f32 %v1476_v56, %v1568_v1 }
 0x13f   : > { %v732_v17 = vsub.f32 %v639_v18, %v1570_v46  ;;  %v702_v20 = vsub.f32 %v1478_v58, %v1570_v46  ;;  %v704_v22 = vsub.f32 %v1490_v13, %v1570_v46  ;;  %v706_v15 = vsub.f32 %v1480_v60, %v1570_v46 }
 0x140   : > { %v793_v27 = vmul.f32 1.442695, %v731_v50  ;;  %v708_v30 = vsub.f32 %v1492_v14, %v1570_v46  ;;  %v710_v31 = vsub.f32 %v1500_v21, %v1570_v46  ;;  %v712_v34 = vsub.f32 %v1506_v28, %v1570_v46 }
 0x141   : > { %v795_v18 = vmul.f32 1.442695, %v732_v17  ;;  %v714_v58 = vsub.f32 %v1512_v35, %v1570_v46  ;;  %v716_v13 = vsub.f32 %v1518_v42, %v1570_v46  ;;  %v718_v38 = vsub.f32 %v1524_v49, %v1570_v46 }
 0x142   : > { %v720_v60 = vsub.f32 %v1530_v59, %v1570_v46  ;;  %v722_v14 = vsub.f32 %v1536_v16, %v1570_v46  ;;  %v724_v21 = vsub.f32 %v1542_v25, %v1570_v46  ;;  %1217 = vpow2.f32 %v793_v27 }
 0x143   : > { %v726_v28 = vsub.f32 %v1548_v36, %v1570_v46  ;;  %v728_v35 = vsub.f32 %v1554_v45, %v1570_v46  ;;  %v730_v42 = vsub.f32 %v1560_v57, %v1570_v46  ;;  %v735_v49 = vmul.f32 1.442695, %v702_v20 }
 0x144   : > { %v739_v41 = vmul.f32 1.442695, %v704_v22  ;;  %v743_v37 = vmul.f32 1.442695, %v706_v15  ;;  %v707_v59 = vsub.f32 %v1488_v9, %v1568_v1  ;;  %1219 = vpow2.f32 %v795_v18 }
 0x145   : > { %v747_v16 = vmul.f32 1.442695, %v708_v30  ;;  %v709_v25 = vsub.f32 %v1498_v19, %v1568_v1  ;;  %1221 = vpow2.f32 %v735_v49  ;;  %v751_v44 = vmul.f32 1.442695, %v710_v31 }
 0x146   : > { %1223 = vpow2.f32 %v739_v41  ;;  %v755_v36 = vmul.f32 1.442695, %v712_v34  ;;  %v759_v45 = vmul.f32 1.442695, %v714_v58  ;;  %v763_v48 = vmul.f32 1.442695, %v716_v13 }
 0x147   : > { %1225 = vpow2.f32 %v743_v37  ;;  %v767_v57 = vmul.f32 1.442695, %v718_v38  ;;  %v771_v39 = vmul.f32 1.442695, %v720_v60  ;;  %v711_v51 = vsub.f32 %v1504_v26, %v1568_v1 }
 0x148   : > { %1227 = vpow2.f32 %v747_v16  ;;  %v713_v9 = vsub.f32 %v1510_v33, %v1568_v1  ;;  %v715_v19 = vsub.f32 %v1516_v40, %v1568_v1  ;;  %v717_v53 = vsub.f32 %v1522_v47, %v1568_v1 }
 0x149   : > { %1229 = vpow2.f32 %v751_v44  ;;  %v775_v46 = vmul.f32 1.442695, %v722_v14  ;;  %v719_v50 = vsub.f32 %v1528_v54, %v1568_v1  ;;  %v721_v17 = vsub.f32 %v1534_v10, %v1568_v1 }
 0x14a   : > { %1231 = vpow2.f32 %v755_v36  ;;  %v779_v26 = vmul.f32 1.442695, %v724_v21  ;;  %v783_v33 = vmul.f32 1.442695, %v726_v28  ;;  %v787_v22 = vmul.f32 1.442695, %v728_v35 }
 0x14b   : > { %1233 = vpow2.f32 %v759_v45  ;;  %v723_v40 = vsub.f32 %v1540_v23, %v1568_v1  ;;  %v725_v47 = vsub.f32 %v1546_v32, %v1568_v1  ;;  %v727_v54 = vsub.f32 %v1552_v43, %v1568_v1 }
 0x14c   : > { %v1626_v20 = vpop.eup %1217  ;;  %1235 = vpow2.f32 %v763_v48  ;;  %v729_v10 = vsub.f32 %v1558_v52, %v1568_v1  ;;  %v791_v30 = vmul.f32 1.442695, %v730_v42  ;;  %v733_v23 = vmul.f32 1.442695, %v701_v61 }
 0x14d   : > { %1237 = vpow2.f32 %v767_v57  ;;  %v737_v43 = vmul.f32 1.442695, %v703_v62  ;;  %v741_v13 = vmul.f32 1.442695, %v705_v63  ;;  %v745_v60 = vmul.f32 1.442695, %v707_v59 }
 0x14e   : > { %v1630_v27 = vpop.eup %1219  ;;  %1239 = vpow2.f32 %v771_v39  ;;  %v749_v5 = vmul.f32 1.442695, %v709_v25  ;;  %v753_v63 = vmul.f32 1.442695, %v711_v51  ;;  %v757_v35 = vmul.f32 1.442695, %v713_v9 }
 0x14f   : > { %v1222_v15 = vpop.eup %1221  ;;  %1241 = vpow2.f32 %v775_v46  ;;  %v761_v37 = vmul.f32 1.442695, %v715_v19  ;;  %v765_v16 = vmul.f32 1.442695, %v717_v53  ;;  %v769_v45 = vmul.f32 1.442695, %v719_v50 }
 0x150   : > { %v1224_v31 = vpop.eup %1223  ;;  %1243 = vpow2.f32 %v779_v26  ;;  %v773_v57 = vmul.f32 1.442695, %v721_v17  ;;  %v777_v19 = vmul.f32 1.442695, %v723_v40  ;;  %v781_v46 = vmul.f32 1.442695, %v725_v47 }
 0x151   : > { %v1641_v34 = vpop.eup %1225  ;;  %1245 = vpow2.f32 %v783_v33  ;;  %v818_v18 = vadd.f32 %v1224_v31, %v1222_v15  ;;  %v1156_v32 = vpack.c.bf16 %v1224_v31, %v1222_v15  ;;  %v785_v33 = vmul.f32 1.442695, %v727_v54 }
 0x152   : > { %v1646_v58 = vpop.eup %1227  ;;  %1247 = vpow2.f32 %v787_v22  ;;  %v789_v40 = vmul.f32 1.442695, %v729_v10 }
 0x153   : > { %v1651_v38 = vpop.eup %1229  ;;  %1249 = vpow2.f32 %v791_v30  ;;  %v819_v55 = vadd.f32 %v1641_v34, %v818_v18  ;;  %1157 = vmatprep.subr.bf16.mxu1 %v1156_v32  ;;  %v1160_v61 = vpack.c.bf16 %v1646_v58, %v1641_v34 }
 0x154   : > { %v1656_v14 = vpop.eup %1231  ;;  %1251 = vpow2.f32 %v733_v23 }
 0x155   : > { %v1658_v62 = vpop.eup %1233  ;;  %v820_v21 = vadd.f32 %v1646_v58, %v819_v55  ;;  %1253 = vpow2.f32 %v737_v43  ;;  %v1164_v56 = vpack.c.bf16 %v1656_v14, %v1651_v38 }
 0x156   : > { %v1663_v28 = vpop.eup %1235  ;;  %1255 = vpow2.f32 %v741_v13 }
 0x157   : > { %v1665_v42 = vpop.eup %1237  ;;  %v821_v49 = vadd.f32 %v1651_v38, %v820_v21  ;;  %1257 = vpow2.f32 %v745_v60  ;;  %v1168_v41 = vpack.c.bf16 %v1663_v28, %v1658_v62 }
 0x158   : > { %v1670_v59 = vpop.eup %1239  ;;  %1259 = vpow2.f32 %v749_v5 }
 0x159   : > { %v1672_v25 = vpop.eup %1241  ;;  %v822_v44 = vadd.f32 %v1656_v14, %v821_v49  ;;  %1261 = vpow2.f32 %v753_v63  ;;  %v1172_v36 = vpack.c.bf16 %v1670_v59, %v1665_v42 }
 0x15a   : > { %v1677_v48 = vpop.eup %1243  ;;  %1263 = vpow2.f32 %v757_v35 }
 0x15b   : > { %v1679_v39 = vpop.eup %1245  ;;  %v823_v51 = vadd.f32 %v1658_v62, %v822_v44  ;;  %1265 = vpow2.f32 %v761_v37  ;;  %v1176_v9 = vpack.c.bf16 %v1677_v48, %v1672_v25 }
 0x15c   : > { %v1684_v53 = vpop.eup %1247  ;;  %1267 = vpow2.f32 %v765_v16 }
 0x15d   : > { %v1686_v26 = vpop.eup %1249  ;;  %v824_v50 = vadd.f32 %v1663_v28, %v823_v51  ;;  %1269 = vpow2.f32 %v769_v45  ;;  %v1180_v17 = vpack.c.bf16 %v1684_v53, %v1679_v39 }
 0x15e   : > { %v1252_v22 = vpop.eup %1251  ;;  %1271 = vpow2.f32 %v773_v57  ;;  %v1184_v15 = vpack.c.bf16 %v1630_v27, %v1686_v26 }
 0x15f   : > { %v1254_v30 = vpop.eup %1253  ;;  %v825_v47 = vadd.f32 %v1665_v42, %v824_v50  ;;  %1273 = vpow2.f32 %v777_v19 }
 0x160   : > { %v1256_v31 = vpop.eup %1255  ;;  %v797_v23 = vadd.f32 %v1254_v30, %v1252_v22  ;;  %v1158_v18 = vpack.c.bf16 %v1254_v30, %v1252_v22  ;;  %1275 = vpow2.f32 %v781_v46 }
 0x161   : > { %v1258_v32 = vpop.eup %1257  ;;  %v826_v54 = vadd.f32 %v1670_v59, %v825_v47  ;;  %1277 = vpow2.f32 %v785_v33  ;;  %v305_v59 = vld [vmem:[%s276_s7] sm:$0xff] }
 0x162   : > { %v1260_v43 = vpop.eup %1259  ;;  %1159 = vmatpush1.bf16.msra.mxu1 %v1158_v18  ;;  %v798_v13 = vadd.f32 %v1256_v31, %v797_v23  ;;  %v1162_v55 = vpack.c.bf16 %v1258_v32, %v1256_v31  ;;  %1279 = vpow2.f32 %v789_v40 }
 0x163   : > { %v1262_v60 = vpop.eup %1261  ;;  %v827_v52 = vadd.f32 %v1672_v25, %v826_v54  ;;  %1161 = vmatprep.subr.bf16.mxu1 %v1160_v61  ;;  %v306_v25 = vld [vmem:[%s276_s7 + $0x8] sm:$0xff] }
 0x164   : > { %v1264_v1 = vpop.eup %1263  ;;  %v799_v10 = vadd.f32 %v1258_v32, %v798_v13  ;;  %v1166_v5 = vpack.c.bf16 %v1262_v60, %v1260_v43 }
 0x165   : > { %v1266_v21 = vpop.eup %1265  ;;  %v828_v63 = vadd.f32 %v1677_v48, %v827_v52  ;;  %v426_v48 = vpop.permute.xlu0 %425 }
 0x166   : > { %v1268_v35 = vpop.eup %1267  ;;  %1163 = vmatpush1.bf16.msra.mxu1 %v1162_v55  ;;  %v800_v49 = vadd.f32 %v1260_v43, %v799_v10  ;;  %v1170_v37 = vpack.c.bf16 %v1266_v21, %v1264_v1  ;;  %v940_v10 = vlaneseq }
 0x167   : > { %v1270_v16 = vpop.eup %1269  ;;  %v829_v44 = vadd.f32 %v1679_v39, %v828_v63  ;;  %1165 = vmatprep.subr.bf16.mxu1 %v1164_v56  ;;  %v643_v39 = vadd.f32 %v1564_v24, %v426_v48 }
 0x168   : > { %v1272_v45 = vpop.eup %1271  ;;  %v801_v34 = vadd.f32 %v1262_v60, %v800_v49  ;;  %v1174_v58 = vpack.c.bf16 %v1270_v16, %v1268_v35 }
 0x169   : > { %v1274_v61 = vpop.eup %1273  ;;  %v830_v57 = vadd.f32 %v1684_v53, %v829_v44 }
 0x16a   : > { %v1276_v51 = vpop.eup %1275  ;;  %1167 = vmatpush1.bf16.msra.mxu1 %v1166_v5  ;;  %v802_v19 = vadd.f32 %v1264_v1, %v801_v34  ;;  %v1178_v46 = vpack.c.bf16 %v1274_v61, %v1272_v45 }
 0x16b   : > { %v1278_v50 = vpop.eup %1277  ;;  %v831_v33 = vadd.f32 %v1686_v26, %v830_v57  ;;  %1169 = vmatprep.subr.bf16.mxu1 %v1168_v41 }
 0x16c   : > { %v1280_v22 = vpop.eup %1279  ;;  %v803_v38 = vadd.f32 %v1266_v21, %v802_v19  ;;  %v1182_v14 = vpack.c.bf16 %v1278_v50, %v1276_v51  ;;  %v941_v21 = vshrl.u32 %v940_v10, 7 }
 0x16d   : > { %v832_v56 = vadd.f32 %v1630_v27, %v831_v33  ;;  %v1186_v40 = vpack.c.bf16 %v1626_v20, %v1280_v22  ;;  %v308_v27 = vld [vmem:[%s276_s7 + $0x18] sm:$0xff] }
 0x16e   : > { %1171 = vmatpush1.bf16.msra.mxu1 %v1170_v37  ;;  %v804_v30 = vadd.f32 %v1268_v35, %v803_v38  ;;  %v942_v49 = vsub.s32 0, %v941_v21 }
 0x16f   : > { %1173 = vmatprep.subr.bf16.mxu1 %v1172_v36  ;;  %v307_v36 = vld [vmem:[%s276_s7 + $0x10] sm:$0xff] }
 0x170   : > { %v805_v47 = vadd.f32 %v1270_v16, %v804_v30 }
 0x172   : > { %1175 = vmatpush1.bf16.msra.mxu1 %v1174_v58  ;;  %v806_v31 = vadd.f32 %v1272_v45, %v805_v47 }
 0x173   : > { %1177 = vmatprep.subr.bf16.mxu1 %v1176_v9  ;;  %v1141_v9 = vmul.f32 -1.442695, %v643_v39 }
 0x174   : > { %v807_v62 = vadd.f32 %v1274_v61, %v806_v31 }
 0x175   : > { %1281 = vpow2.f32 %v1141_v9 }
 0x176   : > { %1179 = vmatpush1.bf16.msra.mxu1 %v1178_v46  ;;  %v808_v28 = vadd.f32 %v1276_v51, %v807_v62 }
 0x177   : > { %1181 = vmatprep.subr.bf16.mxu1 %v1180_v17  ;;  %v833_v17 = vrot.slane %v832_v56, 4 }
 0x178   : > { %v809_v41 = vadd.f32 %v1278_v50, %v808_v28 }
 0x179   : > { %v834_v18 = vadd.f32 %v833_v17, %v832_v56 }
 0x17a   : > { %1183 = vmatpush1.bf16.msra.mxu1 %v1182_v14  ;;  %v810_v23 = vadd.f32 %v1280_v22, %v809_v41 }
 0x17b   : > { %1185 = vmatprep.subr.bf16.mxu1 %v1184_v15  ;;  %v835_v54 = vrot.slane %v834_v18, 2 }
 0x17c   : > { %v811_v42 = vadd.f32 %v1626_v20, %v810_v23  ;;  %v645_v20 = vadd.f32 %v1566_v29, %v426_v48 }
 0x17d   : > { %v836_v55 = vadd.f32 %v835_v54, %v834_v18 }
 0x17e   : > { %1187 = vmatpush1.bf16.msra.mxu1 %v1186_v40  ;;  %v1142_v53 = vmul.f32 -1.442695, %v645_v20  ;;  %v812_v26 = vrot.slane %v811_v42, 4 }
 0x17f   : > { %v1282_v43 = vpop.eup %1281  ;;  %v837_v24 = vrot.slane %v836_v55, 1 }
 0x180   : > { %1283 = vpow2.f32 %v1142_v53  ;;  %v813_v15 = vadd.f32 %v812_v26, %v811_v42  ;;  %v653_v60 = vadd.f32 1.0, %v1282_v43 }
 0x181   : > { %906 = vmatmul.mubr.f32.vlgmr.msra.gmra.mrb[0].mxu1 %v305_v59  ;;  %v838_v5 = vadd.f32 %v837_v24, %v836_v55 }
 0x182   : > { %911 = vmatprep.mubr.f32.mxu1 %v1317_v0  ;;  %v814_v32 = vrot.slane %v813_v15, 2  ;;  %1285 = vrcp.f32 %v653_v60 }
 0x185   : > { %912 = vmatmul.mubr.f32.gmra.mrb[2].mxu1 %v306_v25 }
 0x186   : > { %917 = vmatprep.mubr.f32.mxu1 %v1317_v0 }
 0x189   : > { %918 = vmatmul.mubr.f32.gmra.mrb[4].mxu1 %v307_v36 }
 0x18a   : > { %923 = vmatprep.mubr.f32.mxu1 %v1317_v0  ;;  %v1284_v13 = vpop.eup %1283  ;;  %v815_v0 = vadd.f32 %v814_v32, %v813_v15 }
 0x18b   : > { %v654_v52 = vadd.f32 1.0, %v1284_v13 }
 0x18c   : > { %v816_v1 = vrot.slane %v815_v0, 1  ;;  %v1286_v63 = vpop.eup %1285 }
 0x18d   : > { %924 = vmatmul.mubr.f32.gmra.mrb[6].mxu1 %v308_v27  ;;  %1287 = vrcp.f32 %v654_v52  ;;  %v938_v37 = vsub.f32 1.0, %v1286_v63  ;;  %v959_v44 = vrot.slane %v1286_v63, %v942_v49 }
 0x18e   : > { %v817_v29 = vadd.f32 %v816_v1, %v815_v0 }
 0x18f   : > { %v943_v51 = vrot.slane %v938_v37, %v942_v49  ;;  %v964_v22 = vmul.f32 %v959_v44, %v1376_v4  ;;  %v966_v28 = vmul.f32 %v959_v44, %v1381_v6  ;;  %v968_v39 = vmul.f32 %v959_v44, %v1391_v11 }
 0x190   : > { %1289 = vrcp.f32 %v817_v29  ;;  %v970_v32 = vmul.f32 %v959_v44, %v1393_v12 }
 0x191   : > { %1291 = vrcp.f32 %v838_v5 }
 0x197   : > { %v1288_v35 = vpop.eup %1287 }
 0x198   : > { %v939_v16 = vsub.f32 1.0, %v1288_v35  ;;  %v963_v58 = vrot.slane %v1288_v35, %v942_v49 }
 0x19a   : > { %v1290_v45 = vpop.eup %1289  ;;  %v947_v50 = vrot.slane %v939_v16, %v942_v49  ;;  %v965_v14 = vmul.f32 %v963_v58, %v1372_v2  ;;  %v967_v23 = vmul.f32 %v963_v58, %v1374_v3  ;;  %v969_v6 = vmul.f32 %v963_v58, %v1383_v7 }
 0x19b   : > { %v1292_v61 = vpop.eup %1291  ;;  %v971_v11 = vmul.f32 %v963_v58, %v1385_v8 }
 0x254   : > { %v907_v34 = vpop.f32.mrb[0].mxu1 }
 0x255   : > { %v930_v57 = vmul.f32 %v1290_v45, %v907_v34  ;;  %v909_v19 = vpop.f32.mrb[1].mxu1 }
 0x256   : > { %v931_v46 = vmul.f32 %v1292_v61, %v909_v19 }
 0x257   : > { %v948_v33 = vmul.f32 %v943_v51, %v930_v57 }
 0x258   : > { %v949_v38 = vmul.f32 %v947_v50, %v931_v46  ;;  %v913_v56 = vpop.f32.mrb[2].mxu1 }
 0x259   : > { %v972_v40 = vadd.f32 %v964_v22, %v948_v33  ;;  %v932_v30 = vmul.f32 %v1290_v45, %v913_v56  ;;  %v915_v47 = vpop.f32.mrb[3].mxu1 }
 0x25a   : > { %v973_v31 = vadd.f32 %v965_v14, %v949_v38  ;;  %v933_v62 = vmul.f32 %v1292_v61, %v915_v47 }
 0x25b   : > { %980 = vst [vmem:[%s1742_s10] sm:$0xff] %v972_v40  ;;  %v950_v4 = vmul.f32 %v943_v51, %v932_v30 }
 0x25c   : > { %981 = vst [vmem:[%s1742_s10 + $0x8] sm:$0xff] %v973_v31  ;;  %v951_v41 = vmul.f32 %v947_v50, %v933_v62  ;;  %v919_v42 = vpop.f32.mrb[4].mxu1 }
 0x25d   : > { %v974_v59 = vadd.f32 %v966_v28, %v950_v4  ;;  %v934_v25 = vmul.f32 %v1290_v45, %v919_v42  ;;  %v921_v2 = vpop.f32.mrb[5].mxu1 }
 0x25e   : > { %v975_v36 = vadd.f32 %v967_v23, %v951_v41  ;;  %v935_v27 = vmul.f32 %v1292_v61, %v921_v2 }
 0x25f   : > { %982 = vst [vmem:[%s1742_s10 + $0x10] sm:$0xff] %v974_v59  ;;  %v952_v48 = vmul.f32 %v943_v51, %v934_v25 }
 0x260   : > { %983 = vst [vmem:[%s1742_s10 + $0x18] sm:$0xff] %v975_v36  ;;  %v953_v20 = vmul.f32 %v947_v50, %v935_v27  ;;  %v925_v9 = vpop.f32.mrb[6].mxu1 }
 0x261   : > { %v976_v3 = vadd.f32 %v968_v39, %v952_v48  ;;  %v936_v53 = vmul.f32 %v1290_v45, %v925_v9  ;;  %v927_v26 = vpop.f32.mrb[7].mxu1 }
 0x262   : > { %v977_v17 = vadd.f32 %v969_v6, %v953_v20  ;;  %v937_v15 = vmul.f32 %v1292_v61, %v927_v26 }
 0x263   : > { %984 = vst [vmem:[%s1742_s10 + $0x20] sm:$0xff] %v976_v3  ;;  %v954_v18 = vmul.f32 %v943_v51, %v936_v53 }
 0x264   : > { %985 = vst [vmem:[%s1742_s10 + $0x28] sm:$0xff] %v977_v17  ;;  %v955_v54 = vmul.f32 %v947_v50, %v937_v15 }
 0x265   : > { %v978_v43 = vadd.f32 %v970_v32, %v954_v18 }
 0x266   : > { %v979_v13 = vadd.f32 %v971_v11, %v955_v54 }
 0x267   : > { %986 = vst [vmem:[%s1742_s10 + $0x30] sm:$0xff] %v978_v43 }
 0x268   : > { %987 = vst [vmem:[%s1742_s10 + $0x38] sm:$0xff] %v979_v13 }
 0x269 PF: > { %s14_s17 = sadd.s32 1, %s1315_s17   ;;  %s1773_s15 = smov %s1311_s16 }
 0x26a   : > { %p11_p5 = scmp.ge.s32.totalorder %s14_s17, 4   ;;  %s1774_s16 = smov %s1776_s18 }
 0x26c   :  { %13 = sbr.rel (!%p11_p5) target bundleno = 2 (0x2), region = 75 }

</bundles_post_ra>
